<compile_context>
chip_gen: v7x
topology: tpu7x:2x2x1
jax: 0.10.0
libtpu: 0.0.40
codegen_flags: <defaults>
</compile_context>

<pallas_src>
import jax
import jax.numpy as jnp
from jax.experimental import pallas as pl
from jax.experimental.pallas import tpu as pltpu

_LANES = 128              # lane width of a vreg
_MAX_BLOCK_ROWS = 4096    # 4096x128 f32 = 2 MiB/tile; 2 arrays x 2 bufs = 8 MiB (< 16 MiB v5e)
_SINGLE_BLOCK_MAX_ROWS = 2048  # above this, force >=2 grid blocks (v7x megacore sharding)


def _tan_kernel(x_ref, o_ref):
    # Elementwise tan on the whole tile (EUP sin/cos + exact divide).
    o_ref[...] = jnp.tan(x_ref[...])


def _round_up(a: int, b: int) -> int:
    return ((a + b - 1) // b) * b


def _cdiv(a: int, b: int) -> int:
    return -(-a // b)


def _sublanes_for(dtype) -> int:
    # 8 rows/vreg for 4-byte dtypes, 16 for 2-byte, 32 for 1-byte (sublane packing).
    return 32 // jnp.dtype(dtype).itemsize


def tan_forward(x: jax.Array) -> jax.Array:
    """Elementwise tan(x) via a Pallas TPU kernel; any shape, dtype preserved."""
    orig_shape = x.shape
    dtype = x.dtype
    n = x.size
    itemsize = jnp.dtype(dtype).itemsize
    sublanes = _sublanes_for(dtype)

    # ---- Lane-dense slab: flatten -> (rows, 128), padding only if required ----
    rows = max(_round_up(_cdiv(n, _LANES), sublanes), sublanes)
    padded = rows * _LANES

    flat = x.reshape(-1)
    needs_pad = padded != n
    if needs_pad:
        flat = jnp.pad(flat, (0, padded - n))
    slab = flat.reshape(rows, _LANES)

    cost = pl.CostEstimate(
        flops=n, transcendentals=2 * n, bytes_accessed=2 * n * itemsize)

    if rows <= _SINGLE_BLOCK_MAX_ROWS:
        # Single block: whole slab resident in VMEM, no grid-step overhead.
        out = pl.pallas_call(
            _tan_kernel,
            out_shape=jax.ShapeDtypeStruct((rows, _LANES), dtype),
            in_specs=[pl.BlockSpec(memory_space=pltpu.MemorySpace.VMEM)],
            out_specs=pl.BlockSpec(memory_space=pltpu.MemorySpace.VMEM),
            cost_estimate=cost,
        )(slab)
    else:
        # Tiled row axis; auto double-buffered DMA pipeline, >=2 parallel blocks.
        block_rows = min(_MAX_BLOCK_ROWS, _round_up(_cdiv(rows, 2), sublanes))
        num_blocks = _cdiv(rows, block_rows)  # ragged last block: OOB writes masked
        out = pl.pallas_call(
            _tan_kernel,
            out_shape=jax.ShapeDtypeStruct((rows, _LANES), dtype),
            grid=(num_blocks,),
            in_specs=[pl.BlockSpec((block_rows, _LANES), lambda i: (i, 0))],
            out_specs=pl.BlockSpec((block_rows, _LANES), lambda i: (i, 0)),
            compiler_params=pltpu.CompilerParams(
                dimension_semantics=("parallel",)),
            cost_estimate=cost,
        )(slab)

    if needs_pad:
        return out.reshape(-1)[:n].reshape(orig_shape)
    return out.reshape(orig_shape)


def make_normal_batch(size: int, batch_size: int, key) -> jax.Array:
    # MultivariateNormal(zeros, I) sample == standard normal (batch_size, size).
    return jax.random.normal(key, (batch_size, size), dtype=jnp.float32)


if __name__ == "__main__":
    hparams = {"channels": 32, "batch_size": 8}

    key = jax.random.PRNGKey(0)
    k_small, k_big = jax.random.split(key)

    # --- shipped module size: 8 x 32 (single-block path, padded slab) ---
    x = make_normal_batch(hparams["channels"], hparams["batch_size"], k_small)
    y = jax.block_until_ready(tan_forward(x))
    y_ref = jnp.tan(x)
    assert y.shape == x.shape and y.dtype == x.dtype
    assert jnp.allclose(y, y_ref, atol=1e-5, rtol=1e-5)

    # --- larger check: tiled (grid) path, ragged final block, padding ---
    # (inputs clipped away from the tan poles so the tolerance check is stable)
    x_big = jnp.clip(
        jax.random.normal(k_big, (3000, 300), dtype=jnp.float32), -1.3, 1.3)
    y_big = jax.block_until_ready(tan_forward(x_big))
    assert y_big.shape == x_big.shape and y_big.dtype == x_big.dtype
    assert jnp.allclose(y_big, jnp.tan(x_big), atol=1e-4, rtol=1e-4)

    # --- exact multiple of 8*128: no-pad / no-slice fast path ---
    x_np = jax.random.normal(key, (16, 1024), dtype=jnp.float32)
    y_np = jax.block_until_ready(tan_forward(x_np))
    assert jnp.allclose(y_np, jnp.tan(x_np), atol=1e-5, rtol=1e-5)

    print("KERNEL_OK")
</pallas_src>

<mosaic_0001>
module attributes {stable_mosaic.version = 11 : i64} {
  func.func @_tan_kernel(%arg0: memref<8x128xf32, #tpu.memory_space<vmem>>, %arg1: memref<8x128xf32, #tpu.memory_space<vmem>>) attributes {dimension_semantics = [], scalar_prefetch = 0 : i64, scratch_operands = 0 : i64, tpu.core_type = #tpu.core_type<tc>} {
    %c0 = arith.constant 0 : index
    %c0_0 = arith.constant 0 : index
    %0 = vector.load %arg0[%c0, %c0_0] : memref<8x128xf32, #tpu.memory_space<vmem>>, vector<8x128xf32>
    %1 = math.tan %0 : vector<8x128xf32>
    %c0_1 = arith.constant 0 : index
    %c0_2 = arith.constant 0 : index
    %2 = vector.load %arg1[%c0_1, %c0_2] : memref<8x128xf32, #tpu.memory_space<vmem>>, vector<8x128xf32>
    tpu.vector_store %arg1[%c0_1, %c0_2], %1 {strides = array<i32>} : memref<8x128xf32, #tpu.memory_space<vmem>>, vector<8x128xf32>,
    return
  }
}

</mosaic_0001>

<bundles_post_ra>
// kernel: tpu_custom_call.1
= control target key start
LH: loop header
LB: loop body
LE: loop exit
PB: predicated region body
PF: predicated region fallthrough
CT: control target
= control target key end

     0   :  { %6 = vsyncpa [#allocation3], 0  ;;  %s286_s0 = inlined_call_operand.hbm [shape: f32[8,128], index: 0, kind: input, shape index: {}]   ;;  %s287_s1 = inlined_call_operand.hbm [shape: f32[8,128], index: 1, kind: output, shape index: {}]  }
   0x1   :  { %7 = vsyncpa [#allocation4], 0  ;;  %s223_s6 = smov [#allocation2]   ;;  %s175_s10 = scalar_lea.hbm %s286_s0, 128 }
   0x2   :  { %s14_s7 = sshll.u32 %s223_s6, 4  ;;  %p176_p0 = scmp.ne.s32.totalorder %s286_s0, %s175_s10  ;;  %s15_s7 = int_to_ptr.vmem [resolvable:$true] %s14_s7 }
   0x3   :  { %p179_p1 = scmp.lt.u32.totalorder %s175_s10, %s286_s0 }
   0x5   :  { %p181_p2 = pnand %p179_p1, %p176_p0 }
   0x7   :  { %184 = shalt.err (!%p181_p2)
}
   0x8   :  { %s185_s15 = scalar_lea.vmem %s15_s7, 128  ;;  %p190_p4 = scmp.lt.s32.totalorder %s15_s7, %s15_s7 }
   0x9   :  { %p186_p3 = scmp.ne.s32.totalorder %s15_s7, %s185_s15  ;;  %p191_p5 = scmp.lt.s32.totalorder %s185_s15, %s185_s15 }
   0xb   :  { %p192_p6 = por %p191_p5, %p190_p4 }
   0xd   :  { %p193_p7 = pnand %p192_p6, %p186_p3 }
   0xf   :  { %196 = shalt.err (!%p193_p7)
}
  0x10   :  { %17 = dma.hbm_to_vmem [thread:$0]  %s286_s0, 128, %s15_s7, [#allocation3]  }
  0x11   :  { %219 = dma.done.wait [#allocation3], 128  }
  0x12   :  { %220 = vsyncadd [#allocation3], 4294967168  ;;  %v253_v0 = vld [vmem:[#allocation2] sm:$0xff]  ;;  %v224_v12 = vmov 683565275   ;;  %s230_s0 = smov [#allocation5]  }
  0x13   :  { %v25_v1 = vand.u32 2139095040, %v253_v0  ;;  %v22_v3 = vand.u32 2147483647, %v253_v0  ;;  %v225_v14 = vmov 2475754826   ;;  %vm24_vm7 = vcmp.lt.s32.totalorder %v253_v0, 0 }
  0x14   :  { %v226_v16 = vmov 2131351028   ;;  %v227_v18 = vmov 2102212464   ;;  %v228_v20 = vmov 920167782   ;;  %vm114_vm15 = vweird.f32 %v253_v0 }
  0x15   :  { %v26_v2 = vshrl.u32 %v25_v1, 23  ;;  %v29_v6 = vand.u32 8388607, %v22_v3  ;;  %v229_v27 = vmov 1326507024   ;;  %s144_s18 = sshll.u32 %s230_s0, 4  ;;  %s145_s18 = int_to_ptr.vmem [resolvable:$true] %s144_s18 }
  0x16   :  { %vm23_vm8 = vcmp.le.f32.partialorder %v22_v3, 0.7853982  ;;  %s197_s19 = scalar_lea.vmem %s145_s18, 128  ;;  %p202_p9 = scmp.lt.s32.totalorder %s145_s18, %s145_s18 }
  0x17   :  { %v153_v4 = vadd.s32 4294967169, %v26_v2  ;;  %v30_v9 = vor.u32 8388608, %v29_v6  ;;  %p198_p8 = scmp.ne.s32.totalorder %s145_s18, %s197_s19  ;;  %p203_p10 = scmp.lt.s32.totalorder %s197_s19, %s197_s19 }
  0x19   :  { %v32_v5 = vadd.s32 1, %v153_v4  ;;  %v70_v29 = vshll.u32 %v30_v9, 8  ;;  %p204_p11 = por %p203_p10, %p202_p9 }
  0x1b   :  { %vm33_vm0 = vcmp.gt.s32.totalorder %v32_v5, 0  ;;  %p205_p12 = pnand %p204_p11, %p198_p8 }
  0x1c   :  { %v34_v7 = vsel %vm33_vm0, %v32_v5, 0 }
  0x1d   :  { %v36_v8 = vand.u32 31, %v34_v7  ;;  %v35_v10 = vshrl.u32 %v34_v7, 5 }
  0x1f   :  { %v37_v11 = vsub.s32 32, %v36_v8  ;;  %v39_v13 = vshll.u32 %v224_v12, %v36_v8  ;;  %v42_v15 = vshll.u32 %v225_v14, %v36_v8  ;;  %v45_v17 = vshll.u32 %v226_v16, %v36_v8 }
  0x20   :  { %v48_v19 = vshll.u32 %v227_v18, %v36_v8  ;;  %v51_v21 = vshll.u32 %v228_v20, %v36_v8  ;;  %vm54_vm1 = vcmp.lt.s32.totalorder %v35_v10, 1  ;;  %vm57_vm2 = vcmp.lt.s32.totalorder %v35_v10, 4 }
  0x21   :  { %v38_v22 = vshrl.u32 %v224_v12, %v37_v11  ;;  %v40_v23 = vshrl.u32 %v225_v14, %v37_v11  ;;  %v43_v24 = vshrl.u32 %v226_v16, %v37_v11  ;;  %v46_v25 = vshrl.u32 %v227_v18, %v37_v11 }
  0x22   :  { %v49_v26 = vshrl.u32 %v228_v20, %v37_v11  ;;  %v52_v28 = vshrl.u32 %v229_v27, %v37_v11  ;;  %vm55_vm3 = vcmp.lt.s32.totalorder %v35_v10, 2  ;;  %vm56_vm4 = vcmp.lt.s32.totalorder %v35_v10, 3 }
  0x23   :  { %v41_v30 = vor.u32 %v40_v23, %v39_v13  ;;  %v44_v31 = vor.u32 %v43_v24, %v42_v15  ;;  %v47_v32 = vor.u32 %v46_v25, %v45_v17 }
  0x24   :  { %v50_v33 = vor.u32 %v49_v26, %v48_v19  ;;  %v53_v34 = vor.u32 %v52_v28, %v51_v21 }
  0x25   :  { %v58_v35 = vsel %vm54_vm1, %v38_v22, %v41_v30  ;;  %v59_v36 = vsel %vm57_vm2, %v47_v32, 2102212464  ;;  %v62_v37 = vsel %vm54_vm1, %v41_v30, %v44_v31  ;;  %v66_v38 = vsel %vm54_vm1, %v44_v31, %v47_v32 }
  0x26   :  { %v60_v39 = vsel %vm56_vm4, %v44_v31, %v59_v36  ;;  %v63_v40 = vsel %vm57_vm2, %v50_v33, 920167782  ;;  %v67_v41 = vsel %vm57_vm2, %v53_v34, 1326507024 }
  0x27   :  { %v64_v42 = vsel %vm56_vm4, %v47_v32, %v63_v40  ;;  %v68_v43 = vsel %vm56_vm4, %v50_v33, %v67_v41  ;;  %v61_v44 = vsel %vm55_vm3, %v58_v35, %v60_v39 }
  0x28   :  { %v65_v45 = vsel %vm55_vm3, %v62_v37, %v64_v42  ;;  %v69_v46 = vsel %vm55_vm3, %v66_v38, %v68_v43  ;;  %v77_v51 = vmul.u32 %v70_v29, %v61_v44 }
  0x29   :  { %v259_v47 = vmul.u32.u64.low %v70_v29, %v69_v46  ;;  %v260_v48 = vmul.u32.u64.high %v70_v29, %v69_v46, %v259_v47  ;;  %v262_v49 = vmul.u32.u64.low %v70_v29, %v65_v45  ;;  %v263_v50 = vmul.u32.u64.high %v70_v29, %v65_v45, %v262_v49 }
  0x2b   :  { %vm79_vm5 = vc.u32 %v260_v48, %v262_v49  ;;  %v80_v52 = vadd.s32 1, %v263_v50  ;;  %v78_v63 = vadd.s32 %v262_v49, %v260_v48 }
  0x2d   :  { %v81_v53 = vsel %vm79_vm5, %v80_v52, %v263_v50 }
  0x2e   :  { %v82_v54 = vadd.s32 %v81_v53, %v77_v51 }
  0x30   :  { %v83_v55 = vadd.s32 536870912, %v82_v54 }
  0x32   :  { %v84_v56 = vshrl.u32 %v83_v55, 30 }
  0x34   :  { %v85_v57 = vshll.u32 %v84_v56, 30  ;;  %v108_v15 = vsub.s32 4, %v84_v56 }
  0x36   :  { %v86_v58 = vsub.s32 %v82_v54, %v85_v57  ;;  %v109_v18 = vsel %vm24_vm7, %v108_v15, %v84_v56 }
  0x37   :  { %v111_v19 = vsel %vm23_vm8, 0, %v109_v18 }
  0x38   :  { %v88_v59 = vsub.s32 0, %v86_v58  ;;  %v115_v20 = vand.u32 3, %v111_v19  ;;  %v116_v22 = vadd.s32 3, %v111_v19 }
  0x3a   :  { %v154_v60 = vmin.u32 %v88_v59, %v86_v58  ;;  %vm122_vm9 = vcmp.eq.s32.totalorder %v115_v20, 2  ;;  %vm119_vm10 = vcmp.eq.s32.totalorder %v115_v20, 0  ;;  %vm118_vm11 = vcmp.lt.s32.totalorder %v115_v20, 2 }
  0x3b   :  { %v117_v3 = vand.u32 3, %v116_v22 }
  0x3c   :  { %v90_v61 = vclz %v154_v60 }
  0x3d   :  { %vm127_vm12 = vcmp.eq.s32.totalorder %v117_v3, 0  ;;  %vm130_vm13 = vcmp.eq.s32.totalorder %v117_v3, 2  ;;  %vm126_vm14 = vcmp.lt.s32.totalorder %v117_v3, 2 }
  0x3e   :  { %v155_v62 = vadd.s32 4294967294, %v90_v61 }
  0x40   :  { %vm156_vm6 = vcmp.lt.s32.totalorder %v155_v62, 0 }
  0x41   :  { %v93_v1 = vsel %vm156_vm6, 0, %v155_v62 }
  0x42   :  { %v94_v2 = vsub.s32 32, %v93_v1  ;;  %v95_v4 = vshll.u32 %v86_v58, %v93_v1  ;;  %v98_v5 = vsub.s32 4294967266, %v93_v1 }
  0x44   :  { %v96_v6 = vshrl.u32 %v78_v63, %v94_v2  ;;  %v99_v7 = vadd.s32 127, %v98_v5 }
  0x46   :  { %v97_v8 = vor.u32 %v96_v6, %v95_v4  ;;  %v100_v9 = vshll.u32 %v99_v7, 23 }
  0x48   :  { %v101_v10 = vor.u32 4788187, %v100_v9  ;;  %v104_v11 = vcvt.s32.f32 %v97_v8 }
  0x4a   :  { %v102_v12 = vand.u32 2147483647, %v101_v10 }
  0x4c   :  { %v105_v13 = vmul.f32 %v104_v11, %v102_v12 }
  0x4e   :  { %v106_v14 = vxor.u32 2147483648, %v105_v13 }
  0x50   :  { %v107_v16 = vsel %vm24_vm7, %v106_v14, %v105_v13 }
  0x51   :  { %v110_v17 = vsel %vm23_vm8, %v253_v0, %v107_v16 }
  0x52   :  { %169 = vcosq.f32 %v110_v17 }
  0x53   :  { %171 = vsinq.f32 %v110_v17 }
  0x5c   :  { %v170_v21 = vpop.eup %169 }
  0x5d   :  { %v172_v23 = vpop.eup %171  ;;  %v123_v24 = vxor.u32 2147483648, %v170_v21 }
  0x5e   :  { %v120_v25 = vxor.u32 2147483648, %v172_v23 }
  0x5f   :  { %v124_v26 = vsel %vm122_vm9, %v123_v24, %v172_v23  ;;  %v132_v30 = vsel %vm130_vm13, %v123_v24, %v172_v23 }
  0x60   :  { %v121_v27 = vsel %vm119_vm10, %v170_v21, %v120_v25  ;;  %v129_v29 = vsel %vm127_vm12, %v170_v21, %v120_v25 }
  0x61   :  { %v125_v28 = vsel %vm118_vm11, %v121_v27, %v124_v26  ;;  %v133_v31 = vsel %vm126_vm14, %v129_v29, %v132_v30 }
  0x62   :  { %173 = vrcp.f32 %v125_v28 }
  0x6c   :  { %v174_v32 = vpop.eup %173 }
  0x6d   :  { %v135_v33 = vmul.f32 %v174_v32, %v133_v31 }
  0x6f   :  { %v136_v34 = vsel %vm114_vm15, nan, %v135_v33 }
  0x70   :  { %137 = vst [vmem:[#allocation5] sm:$0xff] %v136_v34 }
  0x71   :  { %208 = shalt.err (!%p205_p12)
}
  0x72   :  { %s209_s22 = scalar_lea.hbm %s287_s1, 128 }
  0x73   :  { %p210_p13 = scmp.ne.s32.totalorder %s287_s1, %s209_s22  ;;  %p213_p0 = scmp.lt.u32.totalorder %s209_s22, %s287_s1 }
  0x75   :  { %p215_p1 = pnand %p213_p0, %p210_p13 }
  0x77   :  { %218 = shalt.err (!%p215_p1)
}
  0x78   :  { %147 = dma.vmem_to_hbm [thread:$0]  %s145_s18, 128, %s287_s1, [#allocation4]  }
  0x79   :  { %221 = dma.done.wait [#allocation4], 128  }
  0x7a   :  { %222 = vsyncadd [#allocation4], 4294967168 }
  0x7b   :  { %151 = vsyncpa [#allocation3], 1 }
  0x7c   :  { %152 = vsyncpa [#allocation4], 1 }

</bundles_post_ra>
